<compile_context>
chip_gen: v7x
topology: tpu7x:2x2x1
jax: 0.10.0
libtpu: 0.0.40
codegen_flags: <defaults>
</compile_context>

<pallas_src>
import jax
import jax.numpy as jnp
from jax import lax
from jax.experimental import pallas as pl
from jax.experimental.pallas import tpu as pltpu

EPS = 1e-5


def _round_up(x, m):
    return (x + m - 1) // m * m


def _convt_stats_kernel(a_ref, w_ref, y_ref, st_ref, acc_ref):
    """Tiled (TM x TK) @ (TK x CP) partial matmul.  On the last K step the
    un-normalized output tile and its per-column sum / sum-of-squares are emitted."""
    k = pl.program_id(1)

    @pl.when(k == 0)
    def _():
        acc_ref[...] = jnp.zeros_like(acc_ref)

    acc_ref[...] += jnp.dot(a_ref[...], w_ref[...],
                            preferred_element_type=jnp.float32)

    @pl.when(k == pl.num_programs(1) - 1)
    def _():
        y = acc_ref[...]
        y_ref[...] = y
        s = jnp.sum(y, axis=0, keepdims=True)              # [1, CP]
        q = jnp.sum(y * y, axis=0, keepdims=True)          # [1, CP]
        z = jnp.zeros((6, y.shape[1]), jnp.float32)        # pad stats block to 8 rows
        st_ref[...] = jnp.concatenate([s, q, z], axis=0)   # [8, CP]


def _bn_apply_kernel(y_ref, sc_ref, sh_ref, o_ref):
    # y * (gamma * rsqrt(var+eps)) + (beta - mean * gamma * rsqrt(var+eps))
    o_ref[...] = y_ref[...] * sc_ref[...] + sh_ref[...]


def unet_decoder_block(x, skip, weight, gamma, beta, *, tm_max=256, tk_max=2048):
    """x, skip: [N, inner_nc, H, W] NCHW.  weight: [in_ch, out_ch, 4, 4]
    (PyTorch ConvTranspose2d layout).  Returns [N, out_ch, 2H, 2W] float32."""
    xc = jnp.concatenate([x, skip], axis=1)
    N, Cin, H, W = xc.shape
    Cout = weight.shape[1]
    Ho, Wo = 2 * H, 2 * W

    # ReLU on the compact input (commutes with the zero padding below).
    xr = jnp.maximum(xc, 0.0)

    # ---- sub-pixel decomposition -------------------------------------------------
    # ConvT(k=4,s=2,p=1):  y[n,co,2m+ph,2q+pw] = sum_{ci,dh,dw}
    #     xpad[n, m+dh, q+dw, ci] * Wsub[dh,dw,ci,ph,pw,co]
    # where xpad is the 1-padded NHWC input and Wsub packs the per-phase 2x2
    # sub-kernels of the 4x4 transposed-conv kernel.
    xh = jnp.transpose(xr, (0, 2, 3, 1))                      # NHWC
    xp = jnp.pad(xh, ((0, 0), (1, 1), (1, 1), (0, 0)))        # [N, H+2, W+2, Cin]
    pats = [xp[:, dh:dh + H, dw:dw + W, :] for dh in range(3) for dw in range(3)]
    A = jnp.concatenate(pats, axis=-1).reshape(N * H * W, 9 * Cin)

    M = N * H * W
    K = 9 * Cin
    CO4 = 4 * Cout
    CP = _round_up(CO4, 128)                                  # lane-dense output width

    # K tiling: TK is a multiple of 128 that divides the padded K.
    Kp0 = _round_up(K, 128)
    if Kp0 <= tk_max:
        TK, Kp = Kp0, Kp0
    else:
        nk = -(-Kp0 // tk_max)
        TK = _round_up(-(-Kp0 // nk), 128)
        Kp = TK * nk
    TM = min(tm_max, _round_up(M, 8))
    Mp = _round_up(M, TM)
    Gm, Gk = Mp // TM, Kp // TK

    # bf16 operands (f32 accumulation happens on the MXU / in VMEM scratch).
    A_p = jnp.zeros((Mp, Kp), jnp.bfloat16).at[:M, :K].set(A.astype(jnp.bfloat16))

    # (phase, window-offset) -> transposed-conv kernel tap index.
    KIDX = {(0, 0): 3, (0, 1): 1, (1, 1): 2, (1, 2): 0}
    Wt = jnp.zeros((3, 3, Cin, 2, 2, Cout), jnp.float32)
    for (ph, dh), kh in KIDX.items():
        for (pw, dw), kw in KIDX.items():
            Wt = Wt.at[dh, dw, :, ph, pw, :].set(weight[:, :, kh, kw])
    Wmat = Wt.reshape(K, CO4)
    W_p = jnp.zeros((Kp, CP), jnp.bfloat16).at[:K, :CO4].set(Wmat.astype(jnp.bfloat16))

    vmem_limit = 32 * 1024 * 1024

    # ---- pass 1: tiled matmul + per-tile BN statistics ----------------------------
    y_raw, stats = pl.pallas_call(
        _convt_stats_kernel,
        out_shape=(jax.ShapeDtypeStruct((Mp, CP), jnp.float32),
                   jax.ShapeDtypeStruct((Gm * 8, CP), jnp.float32)),
        grid=(Gm, Gk),
        in_specs=[
            pl.BlockSpec((TM, TK), lambda i, k: (i, k)),
            pl.BlockSpec((TK, CP), lambda i, k: (k, 0)),
        ],
        out_specs=(
            pl.BlockSpec((TM, CP), lambda i, k: (i, 0)),
            pl.BlockSpec((8, CP), lambda i, k: (i, 0)),
        ),
        scratch_shapes=[pltpu.VMEM((TM, CP), jnp.float32)],
        compiler_params=pltpu.CompilerParams(
            dimension_semantics=("parallel", "arbitrary"),
            vmem_limit_bytes=vmem_limit),
    )(A_p, W_p)

    # ---- BatchNorm2d statistics (training mode: batch mean, biased variance) ------
    st = stats.reshape(Gm, 8, CP)
    s_col = jnp.sum(st[:, 0, :], axis=0)                      # [CP]
    q_col = jnp.sum(st[:, 1, :], axis=0)                      # [CP]
    count = float(N * Ho * Wo)                                # = 4 * M
    s_c = s_col[:CO4].reshape(4, Cout).sum(axis=0)            # fold the 4 phases
    q_c = q_col[:CO4].reshape(4, Cout).sum(axis=0)
    mean = s_c / count
    var = q_c / count - mean * mean
    scale_c = gamma.astype(jnp.float32) * lax.rsqrt(var + EPS)
    shift_c = beta.astype(jnp.float32) - mean * scale_c
    scale = jnp.zeros((1, CP), jnp.float32).at[0, :CO4].set(jnp.tile(scale_c, 4))
    shift = jnp.zeros((1, CP), jnp.float32).at[0, :CO4].set(jnp.tile(shift_c, 4))

    # ---- pass 2: tiled normalize + affine ------------------------------------------
    y_norm = pl.pallas_call(
        _bn_apply_kernel,
        out_shape=jax.ShapeDtypeStruct((Mp, CP), jnp.float32),
        grid=(Gm,),
        in_specs=[
            pl.BlockSpec((TM, CP), lambda i: (i, 0)),
            pl.BlockSpec((1, CP), lambda i: (0, 0)),
            pl.BlockSpec((1, CP), lambda i: (0, 0)),
        ],
        out_specs=pl.BlockSpec((TM, CP), lambda i: (i, 0)),
        compiler_params=pltpu.CompilerParams(
            dimension_semantics=("parallel",),
            vmem_limit_bytes=vmem_limit),
    )(y_raw, scale, shift)

    # ---- un-pack phase-packed channels back to NCHW ---------------------------------
    y6 = y_norm[:M, :CO4].reshape(N, H, W, 2, 2, Cout)        # (n, m, q, ph, pw, co)
    y6 = jnp.transpose(y6, (0, 1, 3, 2, 4, 5)).reshape(N, Ho, Wo, Cout)
    return jnp.transpose(y6, (0, 3, 1, 2))


def reference(x, skip, weight, gamma, beta, *, matmul_dtype=jnp.float32):
    """Pure-JAX reference matching the PyTorch forward (training-mode BN)."""
    xc = jnp.concatenate([x, skip], axis=1)
    xr = jnp.maximum(xc, 0.0)
    w = jnp.transpose(weight, (1, 0, 2, 3))[:, :, ::-1, ::-1]     # OIHW, flipped
    prec = lax.Precision.HIGHEST if matmul_dtype == jnp.float32 else lax.Precision.DEFAULT
    y = lax.conv_general_dilated(
        xr.astype(matmul_dtype), w.astype(matmul_dtype),
        window_strides=(1, 1), padding=((2, 2), (2, 2)),
        lhs_dilation=(2, 2), rhs_dilation=(1, 1),
        dimension_numbers=("NCHW", "OIHW", "NCHW"),
        preferred_element_type=jnp.float32, precision=prec)
    mean = jnp.mean(y, axis=(0, 2, 3), keepdims=True)
    var = jnp.mean(jnp.square(y - mean), axis=(0, 2, 3), keepdims=True)
    yn = (y - mean) * lax.rsqrt(var + EPS)
    return yn * gamma.reshape(1, -1, 1, 1) + beta.reshape(1, -1, 1, 1)


if __name__ == "__main__":
    key = jax.random.PRNGKey(0)
    k1, k2, k3, k4, k5 = jax.random.split(key, 5)

    N, inner_nc, outer_nc, H, W = 2, 4, 4, 16, 16
    in_ch = inner_nc * 2                                      # first_layer=False -> cat

    x = jax.random.normal(k1, (N, inner_nc, H, W), jnp.float32)
    skip = jax.random.normal(k2, (N, inner_nc, H, W), jnp.float32)
    weight = 0.1 * jax.random.normal(k3, (in_ch, outer_nc, 4, 4), jnp.float32)
    gamma = 1.0 + 0.1 * jax.random.normal(k4, (outer_nc,), jnp.float32)
    beta = 0.1 * jax.random.normal(k5, (outer_nc,), jnp.float32)

    out = jax.block_until_ready(unet_decoder_block(x, skip, weight, gamma, beta))
    assert out.shape == (N, outer_nc, 2 * H, 2 * W), out.shape

    # Matched-precision check (bf16 matmul, f32 accumulation) and f32 sanity check.
    ref_bf16 = reference(x, skip, weight, gamma, beta, matmul_dtype=jnp.bfloat16)
    ref_f32 = reference(x, skip, weight, gamma, beta, matmul_dtype=jnp.float32)
    err16 = float(jnp.max(jnp.abs(out - ref_bf16)))
    err32 = float(jnp.max(jnp.abs(out - ref_f32)))
    assert err16 < 2e-2, err16
    assert err32 < 1e-1, err32
    print("KERNEL_OK")
</pallas_src>

<mosaic_0001>
module attributes {stable_mosaic.version = 11 : i64} {
  func.func @_convt_stats_kernel(%arg0: i32, %arg1: i32, %arg2: memref<256x128xbf16, #tpu.memory_space<vmem>>, %arg3: memref<128x128xbf16, #tpu.memory_space<vmem>>, %arg4: memref<256x128xf32, #tpu.memory_space<vmem>>, %arg5: memref<8x128xf32, #tpu.memory_space<vmem>>, %arg6: memref<256x128xf32, #tpu.memory_space<vmem>>) attributes {dimension_semantics = [#tpu.dimension_semantics<parallel>, #tpu.dimension_semantics<arbitrary>], iteration_bounds = array<i64: 2, 1>, scalar_prefetch = 0 : i64, scratch_operands = 1 : i64, tpu.core_type = #tpu.core_type<tc>, window_params = [{transform_indices = @transform_0, window_bounds = array<i64: 256, 128>}, {transform_indices = @transform_1, window_bounds = array<i64: 128, 128>}, {transform_indices = @transform_2, window_bounds = array<i64: 256, 128>}, {transform_indices = @transform_3, window_bounds = array<i64: 8, 128>}]} {
    %c0_i32 = arith.constant 0 : i32
    %0 = arith.cmpi eq, %arg1, %c0_i32 : i32
    %1 = arith.extui %0 : i1 to i32
    %c0_i32_0 = arith.constant 0 : i32
    %2 = arith.cmpi ne, %1, %c0_i32_0 : i32
    scf.if %2 {
      %cst_10 = arith.constant 0.000000e+00 : f32
      %12 = vector.broadcast %cst_10 : f32 to vector<256x128xf32>
      %c0_11 = arith.constant 0 : index
      %c0_12 = arith.constant 0 : index
      %13 = vector.load %arg6[%c0_11, %c0_12] : memref<256x128xf32, #tpu.memory_space<vmem>>, vector<256x128xf32>
      tpu.vector_store %arg6[%c0_11, %c0_12], %12 {strides = array<i32>} : memref<256x128xf32, #tpu.memory_space<vmem>>, vector<256x128xf32>,
    } else {
    }
    %c0 = arith.constant 0 : index
    %c0_1 = arith.constant 0 : index
    %3 = vector.load %arg6[%c0, %c0_1] : memref<256x128xf32, #tpu.memory_space<vmem>>, vector<256x128xf32>
    %c0_2 = arith.constant 0 : index
    %c0_3 = arith.constant 0 : index
    %4 = vector.load %arg2[%c0_2, %c0_3] : memref<256x128xbf16, #tpu.memory_space<vmem>>, vector<256x128xbf16>
    %c0_4 = arith.constant 0 : index
    %c0_5 = arith.constant 0 : index
    %5 = vector.load %arg3[%c0_4, %c0_5] : memref<128x128xbf16, #tpu.memory_space<vmem>>, vector<128x128xbf16>
    %cst = arith.constant dense<0.000000e+00> : vector<256x128xf32>
    %6 = tpu.matmul %4, %5, %cst {dimension_numbers = #tpu.dot_dimension_numbers<[1], [0], [0], [1], [0, 0, 1, 1], [], []>} : vector<256x128xbf16>, vector<128x128xbf16>, vector<256x128xf32> -> vector<256x128xf32>
    %7 = arith.addf %3, %6 : vector<256x128xf32>
    %c0_6 = arith.constant 0 : index
    %c0_7 = arith.constant 0 : index
    %8 = vector.load %arg6[%c0_6, %c0_7] : memref<256x128xf32, #tpu.memory_space<vmem>>, vector<256x128xf32>
    tpu.vector_store %arg6[%c0_6, %c0_7], %7 {strides = array<i32>} : memref<256x128xf32, #tpu.memory_space<vmem>>, vector<256x128xf32>,
    %c0_i32_8 = arith.constant 0 : i32
    %9 = arith.cmpi eq, %arg1, %c0_i32_8 : i32
    %10 = arith.extui %9 : i1 to i32
    %c0_i32_9 = arith.constant 0 : i32
    %11 = arith.cmpi ne, %10, %c0_i32_9 : i32
    scf.if %11 {
      %c0_10 = arith.constant 0 : index
      %c0_11 = arith.constant 0 : index
      %12 = vector.load %arg6[%c0_10, %c0_11] : memref<256x128xf32, #tpu.memory_space<vmem>>, vector<256x128xf32>
      %c0_12 = arith.constant 0 : index
      %c0_13 = arith.constant 0 : index
      %13 = vector.load %arg4[%c0_12, %c0_13] : memref<256x128xf32, #tpu.memory_space<vmem>>, vector<256x128xf32>
      tpu.vector_store %arg4[%c0_12, %c0_13], %12 {strides = array<i32>} : memref<256x128xf32, #tpu.memory_space<vmem>>, vector<256x128xf32>,
      %cst_14 = arith.constant dense<0.000000e+00> : vector<128xf32>
      %14 = vector.multi_reduction <add>, %12, %cst_14 [0] : vector<256x128xf32> to vector<128xf32>
      %15 = vector.shape_cast %14 : vector<128xf32> to vector<1x128xf32>
      %16 = arith.mulf %12, %12 : vector<256x128xf32>
      %cst_15 = arith.constant dense<0.000000e+00> : vector<128xf32>
      %17 = vector.multi_reduction <add>, %16, %cst_15 [0] : vector<256x128xf32> to vector<128xf32>
      %18 = vector.shape_cast %17 : vector<128xf32> to vector<1x128xf32>
      %cst_16 = arith.constant 0.000000e+00 : f32
      %19 = vector.broadcast %cst_16 : f32 to vector<6x128xf32>
      %20 = tpu.concatenate %15, %18, %19 in 0 : vector<1x128xf32>, vector<1x128xf32>, vector<6x128xf32> -> vector<8x128xf32>
      %c0_17 = arith.constant 0 : index
      %c0_18 = arith.constant 0 : index
      %21 = vector.load %arg5[%c0_17, %c0_18] : memref<8x128xf32, #tpu.memory_space<vmem>>, vector<8x128xf32>
      tpu.vector_store %arg5[%c0_17, %c0_18], %20 {strides = array<i32>} : memref<8x128xf32, #tpu.memory_space<vmem>>, vector<8x128xf32>,
    } else {
    }
    return
  }
  func.func @transform_0(%arg0: i32, %arg1: i32) -> (i32, i32) {
    %c0_i32 = arith.constant 0 : i32
    return %arg0, %arg1 : i32, i32
  }
  func.func @transform_1(%arg0: i32, %arg1: i32) -> (i32, i32) {
    %c0_i32 = arith.constant 0 : i32
    %c0_i32_0 = arith.constant 0 : i32
    return %arg1, %c0_i32 : i32, i32
  }
  func.func @transform_2(%arg0: i32, %arg1: i32) -> (i32, i32) {
    %c0_i32 = arith.constant 0 : i32
    %c0_i32_0 = arith.constant 0 : i32
    return %arg0, %c0_i32 : i32, i32
  }
  func.func @transform_3(%arg0: i32, %arg1: i32) -> (i32, i32) {
    %c0_i32 = arith.constant 0 : i32
    %c0_i32_0 = arith.constant 0 : i32
    return %arg0, %c0_i32 : i32, i32
  }
}

</mosaic_0001>

<bundles_post_ra>
// kernel: tpu_custom_call.1
= control target key start
LH: loop header
LB: loop body
LE: loop exit
PB: predicated region body
PF: predicated region fallthrough
CT: control target
= control target key end

     0   :  { %9 = vsyncpa [#allocation4], 0  ;;  %s1916_s0 = inlined_call_operand.hbm [shape: bf16[512,128], index: 0, kind: input, shape index: {}]   ;;  %s1917_s1 = inlined_call_operand.hbm [shape: bf16[128,128], index: 1, kind: input, shape index: {}]   ;;  %s1918_s2 = inlined_call_operand.hbm [shape: f32[512,128], index: 2, kind: output, shape index: {0}]   ;;  %s1919_s3 = inlined_call_operand.hbm [shape: f32[16,128], index: 3, kind: output, shape index: {1}]  }
   0x1   :  { %11 = vsyncpa [#allocation4 + $0x1], 0 }
   0x2   :  { %12 = vsyncpa [#allocation7], 0 }
   0x3   :  { %13 = vsyncpa [#allocation5], 0 }
   0x4   :  { %15 = vsyncpa [#allocation5 + $0x1], 0 }
   0x5   :  { %16 = vsyncpa [#allocation10], 0 }
   0x6   :  { %18 = vsyncpa [#allocation10 + $0x1], 0  ;;  %s1510_s12 = smov 0   ;;  %s1512_s13 = smov 0  }
   0x7   :  { %s1514_s14 = smov 0   ;;  %s1516_s15 = smov 0  }
   0x8   :  { %s1518_s16 = smov 0   ;;  %s1520_s17 = smov 0  }
   0x9 LB: > { %s1064_s18 = sadd.s32 4294967295, %s1480_s17   ;;  %s1065_s19 = sadd.s32 4294967294, %s1480_s17   ;;  %s1480_s17 = sphi %s1520_s17, %s24_s17   ;;  %s1476_s16 = sphi %s1518_s16, %s1943_s16   ;;  %s1472_s15 = sphi %s1516_s15, %s1942_s15   ;;  %s1468_s14 = sphi %s1514_s14, %s1941_s14   ;;  %s1464_s13 = sphi %s1512_s13, %s1940_s13   ;;  %s1460_s12 = sphi %s1510_s12, %s1939_s12  }
   0xa   : > { %p58_p0 = scmp.ne.s32.totalorder %s1464_s13, %s1460_s12  ;;  %p1544_p1 = scmp.eq.s32.totalorder %s1064_s18, 0 }
   0xb   : > { %p1548_p2 = scmp.eq.s32.totalorder %s1064_s18, 1  ;;  %p114_p3 = scmp.eq.s32.totalorder %s1065_s19, 1 }
   0xc   : > { %s1924_s20 = scalar_select %p1544_p1, 1, 0 }
   0xd   : > { %s1925_s21 = scalar_select %p1548_p2, 1, 0 }
   0xe   : > { %p1554_p4 = por %p1544_p1, %p58_p0  ;;  %p1066_p5 = scmp.ge.s32.totalorder %s1480_s17, 1 }
   0xf   : > { %p1559_p6 = por %p114_p3, %p58_p0  ;;  %p147_p7 = scmp.lt.s32.totalorder %s1480_s17, 3 }
  0x10   : > { %s1926_s22 = scalar_select %p1554_p4, 1, 0 }
  0x11   : > { %s1927_s23 = scalar_select %p1559_p6, 1, 0 }
  0x12   : > { %p1564_p8 = pnand %p1066_p5, %p147_p7  ;;  %s1482_s25 = smov [#allocation6]  }
  0x13   : > { %s162_s26 = sshll.u32 %s1482_s25, 4  ;;  %s36_s28 = sadd.s32 1, %s1476_s16  ;;  %s163_s26 = int_to_ptr.vmem [resolvable:$true] %s162_s26 }
  0x14   : > { %s1928_s24 = scalar_select %p1564_p8, 1, 0 }
  0x15   : > { %p1208_p9 = pneg %p1564_p8  ;;  %s1304_s4 = scalar_lea.hbm %s1917_s1, 1024 }
  0x16   : > { %p1305_p12 = scmp.ne.s32.totalorder %s1917_s1, %s1304_s4  ;;  %p1311_p5 = scmp.lt.u32.totalorder %s1304_s4, %s1917_s1 }
  0x17   : > { %p1573_p11 = pnand %p1208_p9, %p1544_p1 }
  0x19   : > { %p1306_p13 = pneg %p1573_p11 }
  0x1b   : > { %p1307_p0 = pnand %p1306_p13, %p1305_p12 }
  0x1d   : > { %p1308_p3 = pneg %p1307_p0 }
  0x1f   : > { %p1313_p7 = pnand %p1311_p5, %p1308_p3 }
  0x21   : > { %1316 = shalt.err (!%p1313_p7)
}
  0x22   : > { %s1317_s9 = scalar_lea.vmem %s163_s26, 1024  ;;  %p1325_p1 = scmp.lt.s32.totalorder %s163_s26, %s163_s26 }
  0x23   : > { %p1318_p9 = scmp.ne.s32.totalorder %s163_s26, %s1317_s9  ;;  %p1326_p4 = scmp.lt.s32.totalorder %s1317_s9, %s1317_s9 }
  0x25   : > { %p1320_p10 = pnand %p1318_p9, %p1306_p13  ;;  %p1327_p8 = por %p1326_p4, %p1325_p1 }
  0x27   : > { %p1321_p6 = pneg %p1320_p10 }
  0x29   : > { %p1328_p2 = pnand %p1327_p8, %p1321_p6 }
  0x2b   : > { %1331 = shalt.err (!%p1328_p2)
}
  0x2c   : > { %s1483_s10 = smov 64   ;;  %s1484_s11 = smov 4  }
  0x2d   : > { %1211 = dma.hbm_to_vmem [thread:$0]  (!%p1573_p11), %s1917_s1, 1024, %s163_s26, [#allocation7], %s1483_s10, %s1483_s10, %s1484_s11  }
  0x2e   : > { %p38_p1 = scmp.ge.s32.totalorder %s36_s28, 2  ;;  %s45_s25 = sadd.s32 1, %s1468_s14 }
  0x2f   : > { %p52_p2 = scmp.ne.s32.totalorder %s1468_s14, %s1464_s13  ;;  %p53_p4 = scmp.eq.s32.totalorder %s1480_s17, 0 }
  0x30   : > { %s1945_s28 = smov (%p38_p1, %s36_s28), 0  ;;  %p1931_p8 = scmp.ne.s32.totalorder %s1925_s21, 0 }
  0x31   : > { %p1603_p6 = por %p53_p4, %p52_p2  ;;  %s40_s30 = ssub.s32 %s1476_s16, %s1945_s28 }
  0x32   : > { %p1609_p10 = por %p1931_p8, %p52_p2  ;;  %p1224_p12 = scmp.lt.s32.totalorder %s1480_s17, 2 }
  0x33   : > { %p43_p11 = scmp.eq.s32.totalorder %s40_s30, 0  ;;  %s176_s26 = sand.u32 1, %s1468_s14  }
  0x34   : > { %s1069_s4 = sshll.u32 %s176_s26, 7  ;;  %s1108_s6 = sshll.u32 %s1476_s16, 11 }
  0x35   : > { %s1618_s5 = scalar_select %p43_p11, %s1468_s14, %s45_s25  }
  0x36   : > { %s1624_s9 = scalar_lea.hbm %s1916_s0, %s1108_s6  ;;  %s180_s21 = scalar_lea.vmem [#allocation3], %s1069_s4 }
  0x37   : > { %s188_s18 = sshll.u32 %s180_s21, 4  ;;  %p1630_p13 = pnand %p1224_p12, %p1603_p6  ;;  %s1626_s18 = int_to_ptr.vmem [resolvable:$true] %s188_s18 }
  0x38   : > { %s1634_s25 = scalar_lea.sflag [#allocation4], %s176_s26  ;;  %s1332_s30 = scalar_lea.hbm %s1624_s9, 2048 }
  0x39   : > { %p1333_p0 = scmp.ne.s32.totalorder %s1624_s9, %s1332_s30  ;;  %p1334_p3 = pneg %p1630_p13 }
  0x3a   : > { %s1337_s29 = scalar_lea.hbm %s1916_s0, 4096  ;;  %p1338_p9 = scmp.lt.u32.totalorder %s1624_s9, %s1916_s0 }
  0x3b   : > { %p1335_p5 = pnand %p1334_p3, %p1333_p0  ;;  %p1339_p1 = scmp.lt.u32.totalorder %s1337_s29, %s1332_s30 }
  0x3c   : > { %p1341_p4 = scmp.lt.u32.totalorder %s1332_s30, %s1624_s9 }
  0x3d   : > { %p1336_p7 = pneg %p1335_p5  ;;  %p1340_p2 = por %p1339_p1, %p1338_p9 }
  0x3f   : > { %p1342_p6 = por %p1341_p4, %p1340_p2 }
  0x41   : > { %p1343_p8 = pnand %p1342_p6, %p1336_p7 }
  0x43   : > { %1346 = shalt.err (!%p1343_p8)
}
  0x44   : > { %s1347_s26 = scalar_lea.vmem %s1626_s18, 2048  ;;  %s1485_s21 = smov [#allocation3]  }
  0x45   : > { %p1348_p12 = scmp.ne.s32.totalorder %s1626_s18, %s1347_s26  ;;  %s1352_s4 = sshll.u32 %s1485_s21, 4  ;;  %s1353_s4 = int_to_ptr.vmem [resolvable:$false] %s1352_s4 }
  0x46   : > { %s1354_s6 = scalar_lea.vmem %s1353_s4, 4096  ;;  %p1355_p5 = scmp.lt.s32.totalorder %s1626_s18, %s1353_s4 }
  0x47   : > { %p1350_p11 = pnand %p1348_p12, %p1334_p3  ;;  %p1356_p9 = scmp.lt.s32.totalorder %s1354_s6, %s1347_s26 }
  0x49   : > { %p1351_p0 = pneg %p1350_p11  ;;  %p1357_p1 = por %p1356_p9, %p1355_p5 }
  0x4b   : > { %p1358_p2 = pnand %p1357_p1, %p1351_p0 }
  0x4d   : > { %1361 = shalt.err (!%p1358_p2)
}
  0x4e   : > { %1215 = dma.hbm_to_vmem [thread:$0]  (!%p1630_p13), %s1624_s9, 2048, %s1626_s18, %s1634_s25, %s1483_s10, %s1483_s10, %s1484_s11  }
  0x4f   : > { %p1934_p3 = scmp.ne.s32.totalorder %s1928_s24, 0 }
  0x50   : > { %s1668_s30 = sand.u32 (!%p1934_p3), 1, %s1464_s13   ;;  %p1935_p7 = scmp.ne.s32.totalorder (!%p1934_p3), %s1926_s22, 0 }
  0x51   : > { %200 = sbr.rel (%p1934_p3) target bundleno = 443 (0x1bb), region = 28  ;;  %s1073_s29 = sshll.u32 (!%p1934_p3), %s1668_s30, 7 }
  0x52   : > { %s203_s7 = scalar_lea.sflag (!%p1934_p3), [#allocation4], %s1668_s30  ;;  %s1672_s8 = scalar_lea.vmem (!%p1934_p3), [#allocation3], %s1073_s29 }
  0x58   : > { %1443 = dma.done.wait (%p1935_p7), %s203_s7, 2048  }
  0x59   : > { %1445 = vsyncadd (%p1935_p7), %s203_s7, 4294965248  ;;  %p1936_p13 = scmp.ne.s32.totalorder %s1924_s20, 0 }
  0x5b   : > { %1447 = dma.done.wait (%p1936_p13), [#allocation7], 1024  }
  0x5c   : > { %1449 = vsyncadd (%p1936_p13), [#allocation7], 4294966272  ;;  %v1280_v0 = vld [vmem:[#allocation6] sm:$0xff]   ;;  %v1281_v1 = vld [vmem:[#allocation6 + $0x8] sm:$0xff]   ;;  %s1075_s20 = sshll.u32 %s1668_s30, 8  ;;  %s1109_s24 = sshll.u32 %s1472_s15, 12 }
  0x5d   : > { %1134 = vmatprep.subr.bf16.mxu0 %v1280_v0  ;;  %1182 = vmatprep.subr.bf16.mxu1 %v1280_v0  ;;  %v1282_v2 = vld [vmem:[#allocation6 + $0x10] sm:$0xff]   ;;  %v1283_v3 = vld [vmem:[#allocation6 + $0x18] sm:$0xff]   ;;  %v1288_v4 = vld [vmem:[%s1672_s8] sm:$0xff]   ;;  %s1701_s22 = scalar_lea.vmem [#allocation8], %s1075_s20  ;;  %s1773_s18 = scalar_lea.hbm %s1918_s2, %s1109_s24 }
  0x5e   : > { %1135 = vmatpush3.bf16.msra.mxu0 %v1280_v0  ;;  %1190 = vmatpush3.bf16.msra.mxu1 %v1280_v0  ;;  %v1284_v5 = vld [vmem:[#allocation6 + $0x20] sm:$0xff]   ;;  %v1285_v6 = vld [vmem:[#allocation6 + $0x28] sm:$0xff]   ;;  %v1286_v8 = vld [vmem:[#allocation6 + $0x30] sm:$0xff]   ;;  %s924_s10 = sshll.u32 %s1701_s22, 4  ;;  %s906_s19 = scalar_lea.sflag [#allocation5], %s1668_s30  ;;  %s1775_s10 = int_to_ptr.vmem [resolvable:$true] %s924_s10 }
  0x5f   : > { %1136 = vmatprep.subr.bf16.mxu0 %v1281_v1  ;;  %1183 = vmatprep.subr.bf16.mxu1 %v1281_v1  ;;  %v1296_v7 = vld [vmem:[%s1672_s8 + $0x40] sm:$0xff]   ;;  %v1287_v9 = vld [vmem:[#allocation6 + $0x38] sm:$0xff]   ;;  %v1289_v10 = vld [vmem:[%s1672_s8 + $0x8] sm:$0xff]   ;;  %s1362_s25 = scalar_lea.vmem %s1775_s10, 4096  ;;  %s1486_s26 = smov [#allocation8]  }
  0x60   : > { %1150 = vmatprep.mubr.bf16.mxu0 %v1288_v4  ;;  %1166 = vmatprep.mubr.bf16.mxu1 %v1296_v7  ;;  %v1297_v11 = vld [vmem:[%s1672_s8 + $0x48] sm:$0xff]   ;;  %v1290_v12 = vld [vmem:[%s1672_s8 + $0x10] sm:$0xff]   ;;  %v1291_v14 = vld [vmem:[%s1672_s8 + $0x18] sm:$0xff]   ;;  %p1363_p4 = scmp.ne.s32.totalorder %s1775_s10, %s1362_s25  ;;  %s1366_s21 = sshll.u32 %s1486_s26, 4  ;;  %s1367_s21 = int_to_ptr.vmem [resolvable:$false] %s1366_s21 }
  0x61   : > { %v1298_v13 = vld [vmem:[%s1672_s8 + $0x50] sm:$0xff]   ;;  %v1299_v15 = vld [vmem:[%s1672_s8 + $0x58] sm:$0xff]   ;;  %v1292_v16 = vld [vmem:[%s1672_s8 + $0x20] sm:$0xff]   ;;  %s1368_s4 = scalar_lea.vmem %s1367_s21, 8192  ;;  %p1369_p12 = scmp.lt.s32.totalorder %s1775_s10, %s1367_s21 }
  0x62   : > { %1137 = vmatpush3.bf16.msra.mxu0 %v1281_v1  ;;  %1191 = vmatpush3.bf16.msra.mxu1 %v1281_v1  ;;  %v1300_v17 = vld [vmem:[%s1672_s8 + $0x60] sm:$0xff]   ;;  %v1293_v18 = vld [vmem:[%s1672_s8 + $0x28] sm:$0xff]   ;;  %v1294_v20 = vld [vmem:[%s1672_s8 + $0x30] sm:$0xff]   ;;  %p1364_p6 = pnand %p1363_p4, %p1609_p10  ;;  %p1370_p11 = scmp.lt.s32.totalorder %s1368_s4, %s1362_s25 }
  0x63   : > { %1138 = vmatprep.subr.bf16.mxu0 %v1282_v2  ;;  %1184 = vmatprep.subr.bf16.mxu1 %v1282_v2  ;;  %v1301_v19 = vld [vmem:[%s1672_s8 + $0x68] sm:$0xff]   ;;  %v1302_v21 = vld [vmem:[%s1672_s8 + $0x70] sm:$0xff]   ;;  %v1295_v22 = vld [vmem:[%s1672_s8 + $0x38] sm:$0xff]  }
  0x64   : > { %v1303_v23 = vld [vmem:[%s1672_s8 + $0x78] sm:$0xff]   ;;  %p1365_p8 = pneg %p1364_p6  ;;  %p1371_p0 = por %p1370_p11, %p1369_p12 }
  0x66   : > { %1139 = vmatpush3.bf16.msra.mxu0 %v1282_v2  ;;  %1192 = vmatpush3.bf16.msra.mxu1 %v1282_v2  ;;  %p1372_p5 = pnand %p1371_p0, %p1365_p8 }
  0x67   : > { %1140 = vmatprep.subr.bf16.mxu0 %v1283_v3  ;;  %1185 = vmatprep.subr.bf16.mxu1 %v1283_v3 }
  0x6a   : > { %1141 = vmatpush3.bf16.msra.mxu0 %v1283_v3  ;;  %1193 = vmatpush3.bf16.msra.mxu1 %v1283_v3 }
  0x6b   : > { %1142 = vmatprep.subr.bf16.mxu0 %v1284_v5  ;;  %1186 = vmatprep.subr.bf16.mxu1 %v1284_v5 }
  0x6e   : > { %1143 = vmatpush3.bf16.msra.mxu0 %v1284_v5  ;;  %1194 = vmatpush3.bf16.msra.mxu1 %v1284_v5 }
  0x6f   : > { %1144 = vmatprep.subr.bf16.mxu0 %v1285_v6  ;;  %1187 = vmatprep.subr.bf16.mxu1 %v1285_v6 }
  0x72   : > { %1145 = vmatpush3.bf16.msra.mxu0 %v1285_v6  ;;  %1195 = vmatpush3.bf16.msra.mxu1 %v1285_v6 }
  0x73   : > { %1146 = vmatprep.subr.bf16.mxu0 %v1286_v8  ;;  %1188 = vmatprep.subr.bf16.mxu1 %v1286_v8 }
  0x76   : > { %1147 = vmatpush3.bf16.msra.mxu0 %v1286_v8  ;;  %1196 = vmatpush3.bf16.msra.mxu1 %v1286_v8 }
  0x77   : > { %1148 = vmatprep.subr.bf16.mxu0 %v1287_v9  ;;  %1189 = vmatprep.subr.bf16.mxu1 %v1287_v9 }
  0x7a   : > { %1149 = vmatpush3.bf16.msra.mxu0 %v1287_v9  ;;  %1197 = vmatpush3.bf16.msra.mxu1 %v1287_v9 }
  0x7d   : > { %1151 = vmatmul.mubr.bf16.vlgmr.msra.gmra.mrb[0].mxu0 %v1289_v10  ;;  %1167 = vmatmul.mubr.bf16.vlgmr.msra.gmra.mrb[0].mxu1 %v1297_v11 }
  0x7e   : > { %1154 = vmatprep.mubr.bf16.mxu0 %v1290_v12  ;;  %1170 = vmatprep.mubr.bf16.mxu1 %v1298_v13 }
  0x85   : > { %1155 = vmatmul.mubr.bf16.gmra.mrb[4].mxu0 %v1291_v14  ;;  %1171 = vmatmul.mubr.bf16.gmra.mrb[4].mxu1 %v1299_v15 }
  0x86   : > { %1158 = vmatprep.mubr.bf16.mxu0 %v1292_v16  ;;  %1174 = vmatprep.mubr.bf16.mxu1 %v1300_v17 }
  0x8d   : > { %1159 = vmatmul.mubr.bf16.gmra.mrb[8].mxu0 %v1293_v18  ;;  %1175 = vmatmul.mubr.bf16.gmra.mrb[8].mxu1 %v1301_v19 }
  0x8e   : > { %1162 = vmatprep.mubr.bf16.mxu0 %v1294_v20  ;;  %1178 = vmatprep.mubr.bf16.mxu1 %v1302_v21 }
  0x95   : > { %1163 = vmatmul.mubr.bf16.gmra.mrb[12].mxu0 %v1295_v22  ;;  %1179 = vmatmul.mubr.bf16.gmra.mrb[12].mxu1 %v1303_v23 }
 0x150   : > { %v1152_v24 = vpop.f32.mrb[0].mxu0  ;;  %v1699_v25 = vpop.f32.mrb[0].mxu1 }
 0x151   : > { %764 = vst [vmem:[%s1701_s22 + $0x10] sm:$0xff] %v1152_v24  ;;  %v536_v26 = vpop.f32.mrb[1].mxu0  ;;  %780 = vst [vmem:[%s1701_s22 + $0x90] sm:$0xff] %v1699_v25  ;;  %v1706_v27 = vpop.f32.mrb[1].mxu1  ;;  %v833_v35 = vmul.f32 %v1152_v24, %v1152_v24 }
 0x152   : > { %762 = vst [vmem:[%s1701_s22] sm:$0xff] %v536_v26  ;;  %v1153_v28 = vpop.f32.mrb[2].mxu0  ;;  %778 = vst [vmem:[%s1701_s22 + $0x80] sm:$0xff] %v1706_v27  ;;  %v1711_v29 = vpop.f32.mrb[2].mxu1  ;;  %v831_v32 = vmul.f32 %v536_v26, %v536_v26 }
 0x153   : > { %765 = vst [vmem:[%s1701_s22 + $0x18] sm:$0xff] %v1153_v28  ;;  %v539_v30 = vpop.f32.mrb[3].mxu0  ;;  %781 = vst [vmem:[%s1701_s22 + $0x98] sm:$0xff] %v1711_v29  ;;  %v1716_v31 = vpop.f32.mrb[3].mxu1  ;;  %v834_v38 = vmul.f32 %v1153_v28, %v1153_v28 }
 0x154   : > { %763 = vst [vmem:[%s1701_s22 + $0x8] sm:$0xff] %v539_v30  ;;  %v794_v33 = vadd.f32 %v539_v30, %v536_v26  ;;  %v832_v34 = vmul.f32 %v539_v30, %v539_v30  ;;  %779 = vst [vmem:[%s1701_s22 + $0x88] sm:$0xff] %v1716_v31 }
 0x156   : > { %v795_v36 = vadd.f32 %v1152_v24, %v794_v33  ;;  %v863_v37 = vadd.f32 %v832_v34, %v831_v32 }
 0x158   : > { %v864_v39 = vadd.f32 %v863_v37, %v833_v35  ;;  %v1156_v40 = vpop.f32.mrb[4].mxu0  ;;  %v796_v41 = vadd.f32 %v1153_v28, %v795_v36  ;;  %v1721_v42 = vpop.f32.mrb[4].mxu1 }
 0x159   : > { %768 = vst [vmem:[%s1701_s22 + $0x30] sm:$0xff] %v1156_v40  ;;  %v552_v43 = vpop.f32.mrb[5].mxu0  ;;  %784 = vst [vmem:[%s1701_s22 + $0xb0] sm:$0xff] %v1721_v42  ;;  %v1726_v44 = vpop.f32.mrb[5].mxu1  ;;  %v837_v55 = vmul.f32 %v1156_v40, %v1156_v40 }
 0x15a   : > { %766 = vst [vmem:[%s1701_s22 + $0x20] sm:$0xff] %v552_v43  ;;  %v797_v45 = vadd.f32 %v796_v41, %v552_v43  ;;  %v835_v46 = vmul.f32 %v552_v43, %v552_v43  ;;  %v865_v47 = vadd.f32 %v864_v39, %v834_v38  ;;  %v1157_v48 = vpop.f32.mrb[6].mxu0  ;;  %782 = vst [vmem:[%s1701_s22 + $0xa0] sm:$0xff] %v1726_v44  ;;  %v1731_v49 = vpop.f32.mrb[6].mxu1 }
 0x15b   : > { %769 = vst [vmem:[%s1701_s22 + $0x38] sm:$0xff] %v1157_v48  ;;  %v555_v50 = vpop.f32.mrb[7].mxu0  ;;  %785 = vst [vmem:[%s1701_s22 + $0xb8] sm:$0xff] %v1731_v49  ;;  %v1736_v51 = vpop.f32.mrb[7].mxu1  ;;  %v838_v58 = vmul.f32 %v1157_v48, %v1157_v48 }
 0x15c   : > { %v866_v52 = vadd.f32 %v865_v47, %v835_v46  ;;  %767 = vst [vmem:[%s1701_s22 + $0x28] sm:$0xff] %v555_v50  ;;  %v798_v53 = vadd.f32 %v797_v45, %v555_v50  ;;  %v836_v54 = vmul.f32 %v555_v50, %v555_v50  ;;  %783 = vst [vmem:[%s1701_s22 + $0xa8] sm:$0xff] %v1736_v51 }
 0x15e   : > { %v799_v56 = vadd.f32 %v1156_v40, %v798_v53  ;;  %v867_v57 = vadd.f32 %v866_v52, %v836_v54 }
 0x160   : > { %v868_v59 = vadd.f32 %v867_v57, %v837_v55  ;;  %v1160_v60 = vpop.f32.mrb[8].mxu0  ;;  %v800_v61 = vadd.f32 %v1157_v48, %v799_v56  ;;  %v1741_v62 = vpop.f32.mrb[8].mxu1 }
 0x161   : > { %772 = vst [vmem:[%s1701_s22 + $0x50] sm:$0xff] %v1160_v60  ;;  %v568_v63 = vpop.f32.mrb[9].mxu0  ;;  %788 = vst [vmem:[%s1701_s22 + $0xd0] sm:$0xff] %v1741_v62  ;;  %v1746_v0 = vpop.f32.mrb[9].mxu1  ;;  %v841_v11 = vmul.f32 %v1160_v60, %v1160_v60 }
 0x162   : > { %770 = vst [vmem:[%s1701_s22 + $0x40] sm:$0xff] %v568_v63  ;;  %v801_v1 = vadd.f32 %v800_v61, %v568_v63  ;;  %v839_v2 = vmul.f32 %v568_v63, %v568_v63  ;;  %v869_v3 = vadd.f32 %v868_v59, %v838_v58  ;;  %v1161_v4 = vpop.f32.mrb[10].mxu0  ;;  %786 = vst [vmem:[%s1701_s22 + $0xc0] sm:$0xff] %v1746_v0  ;;  %v1751_v5 = vpop.f32.mrb[10].mxu1 }
 0x163   : > { %773 = vst [vmem:[%s1701_s22 + $0x58] sm:$0xff] %v1161_v4  ;;  %v571_v6 = vpop.f32.mrb[11].mxu0  ;;  %789 = vst [vmem:[%s1701_s22 + $0xd8] sm:$0xff] %v1751_v5  ;;  %v1756_v7 = vpop.f32.mrb[11].mxu1  ;;  %v842_v14 = vmul.f32 %v1161_v4, %v1161_v4 }
 0x164   : > { %v870_v8 = vadd.f32 %v869_v3, %v839_v2  ;;  %771 = vst [vmem:[%s1701_s22 + $0x48] sm:$0xff] %v571_v6  ;;  %v802_v9 = vadd.f32 %v801_v1, %v571_v6  ;;  %v840_v10 = vmul.f32 %v571_v6, %v571_v6  ;;  %787 = vst [vmem:[%s1701_s22 + $0xc8] sm:$0xff] %v1756_v7 }
 0x166   : > { %v803_v12 = vadd.f32 %v1160_v60, %v802_v9  ;;  %v871_v13 = vadd.f32 %v870_v8, %v840_v10 }
 0x168   : > { %v872_v15 = vadd.f32 %v871_v13, %v841_v11  ;;  %v1164_v16 = vpop.f32.mrb[12].mxu0  ;;  %v804_v17 = vadd.f32 %v1161_v4, %v803_v12  ;;  %v1763_v18 = vpop.f32.mrb[12].mxu1 }
 0x169   : > { %776 = vst [vmem:[%s1701_s22 + $0x70] sm:$0xff] %v1164_v16  ;;  %v584_v19 = vpop.f32.mrb[13].mxu0  ;;  %792 = vst [vmem:[%s1701_s22 + $0xf0] sm:$0xff] %v1763_v18  ;;  %v1768_v20 = vpop.f32.mrb[13].mxu1 }
 0x16a   : > { %774 = vst [vmem:[%s1701_s22 + $0x60] sm:$0xff] %v584_v19  ;;  %v805_v21 = vadd.f32 %v804_v17, %v584_v19  ;;  %v843_v22 = vmul.f32 %v584_v19, %v584_v19  ;;  %v873_v23 = vadd.f32 %v872_v15, %v842_v14  ;;  %v1165_v24 = vpop.f32.mrb[14].mxu0  ;;  %790 = vst [vmem:[%s1701_s22 + $0xe0] sm:$0xff] %v1768_v20  ;;  %v1780_v26 = vpop.f32.mrb[14].mxu1 }
 0x16b   : > { %777 = vst [vmem:[%s1701_s22 + $0x78] sm:$0xff] %v1165_v24  ;;  %v587_v28 = vpop.f32.mrb[15].mxu0  ;;  %793 = vst [vmem:[%s1701_s22 + $0xf8] sm:$0xff] %v1780_v26  ;;  %v1785_v30 = vpop.f32.mrb[15].mxu1 }
 0x16c   : > { %v874_v32 = vadd.f32 %v873_v23, %v843_v22  ;;  %775 = vst [vmem:[%s1701_s22 + $0x68] sm:$0xff] %v587_v28  ;;  %v806_v33 = vadd.f32 %v805_v21, %v587_v28  ;;  %v844_v34 = vmul.f32 %v587_v28, %v587_v28  ;;  %791 = vst [vmem:[%s1701_s22 + $0xe8] sm:$0xff] %v1785_v30 }
 0x16d   : > { %1375 = shalt.err (!%p1372_p5)
}
 0x16e   : > { %s1376_s6 = scalar_lea.hbm %s1773_s18, 4096  ;;  %s1380_s8 = scalar_lea.hbm %s1918_s2, 8192 }
 0x16f   : > { %p1377_p9 = scmp.ne.s32.totalorder %s1773_s18, %s1376_s6  ;;  %p1381_p3 = scmp.lt.u32.totalorder %s1773_s18, %s1918_s2 }
 0x170   : > { %p1382_p7 = scmp.lt.u32.totalorder %s1380_s8, %s1376_s6  ;;  %p1384_p4 = scmp.lt.u32.totalorder %s1376_s6, %s1773_s18 }
 0x171   : > { %p1378_p1 = pnand %p1377_p9, %p1609_p10 }
 0x172   : > { %p1383_p13 = por %p1382_p7, %p1381_p3 }
 0x173   : > { %p1379_p2 = pneg %p1378_p1 }
 0x174   : > { %p1385_p6 = por %p1384_p4, %p1383_p13 }
 0x176   : > { %p1386_p8 = pnand %p1385_p6, %p1379_p2 }
 0x178   : > { %1389 = shalt.err (!%p1386_p8)
}
 0x179   : > { %s1487_s24 = smov 128   ;;  %s1488_s11 = smov 8   ;;  %v845_v35 = vmul.f32 %v1164_v16, %v1164_v16  ;;  %v807_v36 = vadd.f32 %v1164_v16, %v806_v33  ;;  %v875_v37 = vadd.f32 %v874_v32, %v844_v34  ;;  %v846_v38 = vmul.f32 %v1165_v24, %v1165_v24 }
 0x17a   : > { %1204 = dma.vmem_to_hbm [thread:$0]  (%p1609_p10), %s1775_s10, 4096, %s1773_s18, %s906_s19, %s1487_s24, %s1487_s24, %s1488_s11   ;;  %v847_v41 = vmul.f32 %v1706_v27, %v1706_v27  ;;  %v848_v48 = vmul.f32 %v1716_v31, %v1716_v31  ;;  %v849_v50 = vmul.f32 %v1699_v25, %v1699_v25  ;;  %v850_v54 = vmul.f32 %v1711_v29, %v1711_v29 }
 0x17b   : > { %v876_v39 = vadd.f32 %v875_v37, %v845_v35  ;;  %v808_v40 = vadd.f32 %v1165_v24, %v807_v36  ;;  %v852_v60 = vmul.f32 %v1736_v51, %v1736_v51  ;;  %v856_v8 = vmul.f32 %v1756_v7, %v1756_v7  ;;  %s1076_s10 = sshll.u32 %s1668_s30, 3  ;;  %s1105_s9 = sshll.u32 %s1472_s15, 7 }
 0x17c   : > { %v861_v16 = vmul.f32 %v1763_v18, %v1763_v18  ;;  %vm900_vm0 = vcmask 1040384   ;;  %s237_s18 = scalar_lea.vmem [#allocation9], %s1076_s10  ;;  %vm902_vm1 = vcmask 1041408   ;;  %s1867_s21 = scalar_lea.hbm %s1919_s3, %s1105_s9 }
 0x17d   : > { %v809_v43 = vadd.f32 %v808_v40, %v1706_v27  ;;  %v877_v45 = vadd.f32 %v876_v39, %v846_v38  ;;  %v851_v27 = vmul.f32 %v1726_v44, %v1726_v44  ;;  %s940_s19 = sshll.u32 %s237_s18, 4  ;;  %s911_s4 = scalar_lea.sflag [#allocation10], %s1668_s30  ;;  %s1869_s19 = int_to_ptr.vmem [resolvable:$true] %s940_s19 }
 0x17e   : > { %s1390_s15 = scalar_lea.vmem %s1869_s19, 128  ;;  %s1489_s6 = smov [#allocation9]  }
 0x17f   : > { %v878_v46 = vadd.f32 %v877_v45, %v847_v41  ;;  %v810_v47 = vadd.f32 %v809_v43, %v1716_v31  ;;  %p1391_p12 = scmp.ne.s32.totalorder %s1869_s19, %s1390_s15  ;;  %s1394_s29 = sshll.u32 %s1489_s6, 4  ;;  %s1395_s29 = int_to_ptr.vmem [resolvable:$false] %s1394_s29 }
 0x180   : > { %s1396_s7 = scalar_lea.vmem %s1395_s29, 256  ;;  %p1397_p5 = scmp.lt.s32.totalorder %s1869_s19, %s1395_s29 }
 0x181   : > { %v811_v52 = vadd.f32 %v1699_v25, %v810_v47  ;;  %v879_v53 = vadd.f32 %v878_v46, %v848_v48  ;;  %v853_v25 = vmul.f32 %v1721_v42, %v1721_v42  ;;  %p1392_p11 = pnand %p1391_p12, %p1609_p10  ;;  %p1398_p9 = scmp.lt.s32.totalorder %s1396_s7, %s1390_s15 }
 0x183   : > { %v880_v55 = vadd.f32 %v879_v53, %v849_v50  ;;  %v812_v56 = vadd.f32 %v1711_v29, %v811_v52  ;;  %v854_v29 = vmul.f32 %v1731_v49, %v1731_v49  ;;  %p1393_p0 = pneg %p1392_p11  ;;  %p1399_p1 = por %p1398_p9, %p1397_p5 }
 0x185   : > { %v813_v57 = vadd.f32 %v812_v56, %v1726_v44  ;;  %v881_v58 = vadd.f32 %v880_v55, %v850_v54  ;;  %v855_v44 = vmul.f32 %v1746_v0, %v1746_v0  ;;  %p1400_p2 = pnand %p1399_p1, %p1393_p0 }
 0x187   : > { %v882_v59 = vadd.f32 %v881_v58, %v851_v27  ;;  %v814_v31 = vadd.f32 %v813_v57, %v1736_v51 }
 0x189   : > { %v815_v61 = vadd.f32 %v1721_v42, %v814_v31  ;;  %v883_v63 = vadd.f32 %v882_v59, %v852_v60  ;;  %v857_v42 = vmul.f32 %v1741_v62, %v1741_v62 }
 0x18b   : > { %v884_v1 = vadd.f32 %v883_v63, %v853_v25  ;;  %v816_v2 = vadd.f32 %v1731_v49, %v815_v61  ;;  %v858_v49 = vmul.f32 %v1751_v5, %v1751_v5 }
 0x18d   : > { %v817_v3 = vadd.f32 %v816_v2, %v1746_v0  ;;  %v885_v4 = vadd.f32 %v884_v1, %v854_v29  ;;  %v859_v0 = vmul.f32 %v1768_v20, %v1768_v20 }
 0x18f   : > { %v886_v6 = vadd.f32 %v885_v4, %v855_v44  ;;  %v818_v51 = vadd.f32 %v817_v3, %v1756_v7 }
 0x191   : > { %v819_v9 = vadd.f32 %v1741_v62, %v818_v51  ;;  %v887_v10 = vadd.f32 %v886_v6, %v856_v8  ;;  %v860_v62 = vmul.f32 %v1785_v30, %v1785_v30 }
 0x193   : > { %v888_v11 = vadd.f32 %v887_v10, %v857_v42  ;;  %v820_v12 = vadd.f32 %v1751_v5, %v819_v9  ;;  %v862_v5 = vmul.f32 %v1780_v26, %v1780_v26 }
 0x195   : > { %v821_v13 = vadd.f32 %v820_v12, %v1768_v20  ;;  %v889_v14 = vadd.f32 %v888_v11, %v858_v49 }
 0x197   : > { %v890_v7 = vadd.f32 %v889_v14, %v859_v0  ;;  %v822_v15 = vadd.f32 %v821_v13, %v1785_v30 }
 0x199   : > { %v823_v17 = vadd.f32 %v1763_v18, %v822_v15  ;;  %v891_v19 = vadd.f32 %v890_v7, %v860_v62 }
 0x19b   : > { %v824_v20 = vadd.f32 %v1780_v26, %v823_v17  ;;  %v892_v21 = vadd.f32 %v891_v19, %v861_v16 }
 0x19d   : > { %v825_v22 = vrot.slane %v824_v20, 4  ;;  %v893_v23 = vadd.f32 %v892_v21, %v862_v5 }
 0x19f   : > { %v826_v24 = vadd.f32 %v825_v22, %v824_v20  ;;  %v894_v28 = vrot.slane %v893_v23, 4 }
 0x1a1   : > { %v827_v32 = vrot.slane %v826_v24, 2  ;;  %v895_v33 = vadd.f32 %v894_v28, %v893_v23 }
 0x1a3   : > { %v828_v30 = vadd.f32 %v827_v32, %v826_v24  ;;  %v896_v34 = vrot.slane %v895_v33, 2 }
 0x1a5   : > { %v829_v35 = vrot.slane %v828_v30, 1  ;;  %v897_v18 = vadd.f32 %v896_v34, %v895_v33 }
 0x1a7   : > { %v898_v36 = vrot.slane %v897_v18, 1  ;;  %v830_v26 = vadd.f32 %v829_v35, %v828_v30 }
 0x1a9   : > { %v899_v37 = vadd.f32 %v898_v36, %v897_v18 }
 0x1ab   : > { %v901_v38 = vsel %vm900_vm0, %v830_v26, %v899_v37 }
 0x1ac   : > { %v903_v39 = vsel %vm902_vm1, %v901_v38, 0.0 }
 0x1ad   : > { %904 = vst [vmem:[%s237_s18] sm:$0xff] %v903_v39 }
 0x1ae   : > { %1403 = shalt.err (!%p1400_p2)
}
 0x1af   : > { %s1404_s30 = scalar_lea.hbm %s1867_s21, 128  ;;  %s1408_s22 = scalar_lea.hbm %s1919_s3, 256 }
 0x1b0   : > { %p1405_p3 = scmp.ne.s32.totalorder %s1867_s21, %s1404_s30  ;;  %p1409_p4 = scmp.lt.u32.totalorder %s1867_s21, %s1919_s3 }
 0x1b1   : > { %p1410_p6 = scmp.lt.u32.totalorder %s1408_s22, %s1404_s30  ;;  %p1412_p12 = scmp.lt.u32.totalorder %s1404_s30, %s1867_s21 }
 0x1b2   : > { %p1406_p7 = pnand %p1405_p3, %p1609_p10 }
 0x1b3   : > { %p1411_p8 = por %p1410_p6, %p1409_p4 }
 0x1b4   : > { %p1407_p13 = pneg %p1406_p7 }
 0x1b5   : > { %p1413_p11 = por %p1412_p12, %p1411_p8 }
 0x1b7   : > { %p1414_p0 = pnand %p1413_p11, %p1407_p13 }
 0x1b9   : > { %1417 = shalt.err (!%p1414_p0)
}
 0x1ba   : > { %1205 = dma.vmem_to_hbm [thread:$0]  (%p1609_p10), %s1869_s19, 128, %s1867_s21, %s911_s4  }
 0x1bb PF: > { %s952_s10 = sand.u32 1, %s1460_s12   ;;  %p1937_p5 = scmp.ne.s32.totalorder %s1927_s23, 0 }
 0x1bc   : > { %p1938_p9 = scmp.ge.s32.totalorder %s1480_s17, 2  ;;  %s953_s9 = scalar_lea.sflag [#allocation5], %s952_s10 }
 0x1be   : > { %p1217_p1 = pnand %p1938_p9, %p1937_p5 }
 0x1c0   : > { %1451 = dma.done.wait (!%p1217_p1), %s953_s9, 4096  }
 0x1c1   : > { %1453 = vsyncadd (!%p1217_p1), %s953_s9, 4294963200  ;;  %s962_s18 = scalar_lea.sflag [#allocation10], %s952_s10 }
 0x1c2   : > { %1455 = dma.done.wait (!%p1217_p1), %s962_s18, 128  }
 0x1c3   : > { %1457 = vsyncadd (!%p1217_p1), %s962_s18, 4294967168  ;;  %s24_s17 = sadd.s32 1, %s1480_s17   ;;  %s1939_s12 = smov %s1464_s13 }
 0x1c4   : > { %p21_p2 = scmp.ge.s32.totalorder %s24_s17, 4   ;;  %s1940_s13 = smov %s1468_s14 }
 0x1c5   : > { %s1941_s14 = smov %s1618_s5  ;;  %s1942_s15 = smov %s1476_s16 }
 0x1c6   : > { %s1943_s16 = smov %s1945_s28  ;;  %23 = sbr.rel (!%p21_p2) target bundleno = 9 (0x9), region = 103 }
 0x1cd   :  { %967 = vsyncpa [#allocation4], 1 }
 0x1ce   :  { %969 = vsyncpa [#allocation4 + $0x1], 1 }
 0x1cf   :  { %970 = vsyncpa [#allocation7], 1 }
 0x1d0   :  { %971 = vsyncpa [#allocation5], 1 }
 0x1d1   :  { %973 = vsyncpa [#allocation5 + $0x1], 1 }
 0x1d2   :  { %974 = vsyncpa [#allocation10], 1 }
 0x1d3   :  { %976 = vsyncpa [#allocation10 + $0x1], 1 }

</bundles_post_ra>
